<compile_context>
chip_gen: v5e
topology: v5e:2x2
jax: 0.10.0
libtpu: 0.0.40
codegen_flags: <defaults>
</compile_context>

<pallas_src>
import jax
import jax.numpy as jnp
from jax.experimental import pallas as pl
from jax.experimental.pallas import tpu as pltpu


def _round_up(n, m):
    return ((n + m - 1) // m) * m


def _mlp_kernel(x_ref, w1_ref, b1_ref, w2_ref, b2_ref, o_ref):
    # x: (TB, in_pad), w1: (in_pad, H_pad), b1: (1, H_pad)
    # w2: (H_pad, out_pad), b2: (1, out_pad), o: (TB, out_pad)
    h = jnp.dot(x_ref[...], w1_ref[...], preferred_element_type=jnp.float32)
    h = jax.nn.sigmoid(h + b1_ref[...])          # f32, EUP transcendental
    o = jnp.dot(h, w2_ref[...], preferred_element_type=jnp.float32)
    o = o + b2_ref[...]
    o_ref[...] = o.astype(o_ref.dtype)


def mlp_network_forward(observed_data, available_forecasts, params,
                        out_timesteps, out_dim):
    """Pallas equivalent of MLPNetwork.forward."""
    w1, b1, w2, b2 = params
    dtype = w1.dtype

    B = observed_data.shape[0]
    parts = [observed_data.reshape(B, -1)]
    if available_forecasts is not None:
        parts.append(available_forecasts.reshape(B, -1))
    inputs_dim = sum(int(p.shape[1]) for p in parts)

    H = w1.shape[1]
    out_total = w2.shape[1]

    # Lane-dense padded dimensions (multiples of 128).
    in_pad = _round_up(inputs_dim, 128)
    H_pad = _round_up(H, 128)
    out_pad = _round_up(out_total, 128)

    # Batch tile: multiple of 8 sublanes, capped so x/out double buffers +
    # resident weights stay comfortably inside scoped VMEM on all generations.
    TB = 256 if B >= 256 else _round_up(B, 8)
    B_pad = _round_up(B, TB)

    # Build the padded lane-dense activation buffer directly (no standalone
    # concat materialization of the un-padded concat result).
    x_pad = jnp.zeros((B_pad, in_pad), dtype)
    off = 0
    for p in parts:
        x_pad = jax.lax.dynamic_update_slice(x_pad, p.astype(dtype), (0, off))
        off += int(p.shape[1])

    # Zero-pad weights/biases once (no-op for the math, see header comment).
    w1_pad = jnp.zeros((in_pad, H_pad), dtype).at[:inputs_dim, :H].set(w1)
    b1_pad = jnp.zeros((1, H_pad), dtype).at[0, :H].set(b1)
    w2_pad = jnp.zeros((H_pad, out_pad), dtype).at[:H, :out_total].set(w2)
    b2_pad = jnp.zeros((1, out_pad), dtype).at[0, :out_total].set(b2)

    cost = pl.CostEstimate(
        flops=2 * B_pad * (in_pad * H_pad + H_pad * out_pad),
        transcendentals=B_pad * H_pad,
        bytes_accessed=4 * (B_pad * in_pad + in_pad * H_pad + H_pad * out_pad
                            + B_pad * out_pad + H_pad + out_pad),
    )

    out_flat = pl.pallas_call(
        _mlp_kernel,
        out_shape=jax.ShapeDtypeStruct((B_pad, out_pad), dtype),
        grid_spec=pl.GridSpec(
            grid=(B_pad // TB,),
            in_specs=[
                pl.BlockSpec((TB, in_pad), lambda i: (i, 0)),      # x tile (pipelined)
                pl.BlockSpec((in_pad, H_pad), lambda i: (0, 0)),   # W1 (resident)
                pl.BlockSpec((1, H_pad), lambda i: (0, 0)),        # b1 (resident)
                pl.BlockSpec((H_pad, out_pad), lambda i: (0, 0)),  # W2 (resident)
                pl.BlockSpec((1, out_pad), lambda i: (0, 0)),      # b2 (resident)
            ],
            out_specs=pl.BlockSpec((TB, out_pad), lambda i: (i, 0)),
        ),
        compiler_params=pltpu.CompilerParams(
            dimension_semantics=("parallel",)),
        cost_estimate=cost,
    )(x_pad, w1_pad, b1_pad, w2_pad, b2_pad)

    # Slice off batch / lane padding, reshape like torch .reshape(-1, T, D).
    return out_flat[:B, :out_total].reshape(-1, out_timesteps, out_dim)


def init_params(key, inputs_dim, hidden_units, out_total, dtype=jnp.float32):
    """Deterministic init mimicking nn.Linear default (U[-1/sqrt(fan_in), +])."""
    k1, k2, k3, k4 = jax.random.split(key, 4)
    lim1 = 1.0 / jnp.sqrt(inputs_dim)
    lim2 = 1.0 / jnp.sqrt(hidden_units)
    w1 = jax.random.uniform(k1, (inputs_dim, hidden_units), dtype, -lim1, lim1)
    b1 = jax.random.uniform(k2, (hidden_units,), dtype, -lim1, lim1)
    w2 = jax.random.uniform(k3, (hidden_units, out_total), dtype, -lim2, lim2)
    b2 = jax.random.uniform(k4, (out_total,), dtype, -lim2, lim2)
    return w1, b1, w2, b2


if __name__ == "__main__":
    # Module config (small, consistent with MLPNetwork __init__):
    #   in_dim        = (hist_dim_in=4, avail_fcst_dim_in=3)
    #   in_timesteps  = (hist_tsteps=8, avail_fcst_tsteps=8)
    #   out_timesteps = 8, out_dim = 4, hidden_units = 32
    B = 2
    hist_dim, hist_tsteps = 4, 8
    fcst_dim, fcst_tsteps = 3, 8
    hidden_units = 32
    out_timesteps, out_dim = 8, 4

    inputs_dim = hist_dim * hist_tsteps + fcst_dim * fcst_tsteps  # 56
    out_total = out_dim * out_timesteps                           # 32

    key = jax.random.PRNGKey(0)
    k_obs, k_fcst, k_params = jax.random.split(key, 3)

    observed_data = jax.random.normal(k_obs, (B, hist_tsteps, hist_dim),
                                      jnp.float32)
    available_forecasts = jax.random.normal(k_fcst, (B, fcst_tsteps, fcst_dim),
                                            jnp.float32)
    params = init_params(k_params, inputs_dim, hidden_units, out_total)

    out = mlp_network_forward(observed_data, available_forecasts, params,
                              out_timesteps, out_dim)
    out = jax.block_until_ready(out)

    assert out.shape == (B, out_timesteps, out_dim), out.shape

    # Cross-check against pure-JAX reference.
    x = jnp.concatenate([observed_data.reshape(B, -1),
                         available_forecasts.reshape(B, -1)], axis=-1)
    w1, b1, w2, b2 = params
    ref = (jax.nn.sigmoid(x @ w1 + b1) @ w2 + b2).reshape(-1, out_timesteps,
                                                          out_dim)
    assert jnp.allclose(out, ref, atol=1e-5, rtol=1e-5)

    print("KERNEL_OK")
</pallas_src>

<mosaic_0001>
module attributes {stable_mosaic.version = 11 : i64} {
  func.func @_mlp_kernel(%arg0: i32, %arg1: memref<8x128xf32, #tpu.memory_space<vmem>>, %arg2: memref<128x128xf32, #tpu.memory_space<vmem>>, %arg3: memref<1x128xf32, #tpu.memory_space<vmem>>, %arg4: memref<128x128xf32, #tpu.memory_space<vmem>>, %arg5: memref<1x128xf32, #tpu.memory_space<vmem>>, %arg6: memref<8x128xf32, #tpu.memory_space<vmem>>) attributes {dimension_semantics = [#tpu.dimension_semantics<parallel>], iteration_bounds = array<i64: 1>, scalar_prefetch = 0 : i64, scratch_operands = 0 : i64, tpu.core_type = #tpu.core_type<tc>, window_params = [{transform_indices = @transform_0, window_bounds = array<i64: 8, 128>}, {pipeline_mode = #tpu.pipeline_mode<synchronous>, transform_indices = @transform_1, window_bounds = array<i64: 128, 128>}, {pipeline_mode = #tpu.pipeline_mode<synchronous>, transform_indices = @transform_2, window_bounds = array<i64: 1, 128>}, {pipeline_mode = #tpu.pipeline_mode<synchronous>, transform_indices = @transform_3, window_bounds = array<i64: 128, 128>}, {pipeline_mode = #tpu.pipeline_mode<synchronous>, transform_indices = @transform_4, window_bounds = array<i64: 1, 128>}, {transform_indices = @transform_5, window_bounds = array<i64: 8, 128>}]} {
    %c0 = arith.constant 0 : index
    %c0_0 = arith.constant 0 : index
    %0 = vector.load %arg1[%c0, %c0_0] : memref<8x128xf32, #tpu.memory_space<vmem>>, vector<8x128xf32>
    %c0_1 = arith.constant 0 : index
    %c0_2 = arith.constant 0 : index
    %1 = vector.load %arg2[%c0_1, %c0_2] : memref<128x128xf32, #tpu.memory_space<vmem>>, vector<128x128xf32>
    %cst = arith.constant dense<0.000000e+00> : vector<8x128xf32>
    %2 = tpu.matmul %0, %1, %cst {dimension_numbers = #tpu.dot_dimension_numbers<[1], [0], [0], [1], [0, 0, 1, 1], [], []>} : vector<8x128xf32>, vector<128x128xf32>, vector<8x128xf32> -> vector<8x128xf32>
    %c0_3 = arith.constant 0 : index
    %c0_4 = arith.constant 0 : index
    %3 = vector.load %arg3[%c0_3, %c0_4] : memref<1x128xf32, #tpu.memory_space<vmem>>, vector<1x128xf32>
    %4 = vector.broadcast %3 : vector<1x128xf32> to vector<8x128xf32>
    %5 = arith.addf %2, %4 : vector<8x128xf32>
    %6 = arith.negf %5 : vector<8x128xf32>
    %7 = math.exp %6 : vector<8x128xf32>
    %cst_5 = arith.constant 1.000000e+00 : f32
    %8 = vector.broadcast %cst_5 : f32 to vector<8x128xf32>
    %9 = arith.addf %8, %7 : vector<8x128xf32>
    %10 = arith.divf %8, %9 : vector<8x128xf32>
    %c0_6 = arith.constant 0 : index
    %c0_7 = arith.constant 0 : index
    %11 = vector.load %arg4[%c0_6, %c0_7] : memref<128x128xf32, #tpu.memory_space<vmem>>, vector<128x128xf32>
    %cst_8 = arith.constant dense<0.000000e+00> : vector<8x128xf32>
    %12 = tpu.matmul %10, %11, %cst_8 {dimension_numbers = #tpu.dot_dimension_numbers<[1], [0], [0], [1], [0, 0, 1, 1], [], []>} : vector<8x128xf32>, vector<128x128xf32>, vector<8x128xf32> -> vector<8x128xf32>
    %c0_9 = arith.constant 0 : index
    %c0_10 = arith.constant 0 : index
    %13 = vector.load %arg5[%c0_9, %c0_10] : memref<1x128xf32, #tpu.memory_space<vmem>>, vector<1x128xf32>
    %14 = vector.broadcast %13 : vector<1x128xf32> to vector<8x128xf32>
    %15 = arith.addf %12, %14 : vector<8x128xf32>
    %c0_11 = arith.constant 0 : index
    %c0_12 = arith.constant 0 : index
    %16 = vector.load %arg6[%c0_11, %c0_12] : memref<8x128xf32, #tpu.memory_space<vmem>>, vector<8x128xf32>
    tpu.vector_store %arg6[%c0_11, %c0_12], %15 {strides = array<i32>} : memref<8x128xf32, #tpu.memory_space<vmem>>, vector<8x128xf32>,
    return
  }
  func.func @transform_0(%arg0: i32) -> (i32, i32) {
    %c0_i32 = arith.constant 0 : i32
    %c0_i32_0 = arith.constant 0 : i32
    return %arg0, %c0_i32 : i32, i32
  }
  func.func @transform_1(%arg0: i32) -> (i32, i32) {
    %c0_i32 = arith.constant 0 : i32
    %c0_i32_0 = arith.constant 0 : i32
    %c0_i32_1 = arith.constant 0 : i32
    return %c0_i32, %c0_i32_0 : i32, i32
  }
  func.func @transform_2(%arg0: i32) -> (i32, i32) {
    %c0_i32 = arith.constant 0 : i32
    %c0_i32_0 = arith.constant 0 : i32
    %c0_i32_1 = arith.constant 0 : i32
    return %c0_i32, %c0_i32_0 : i32, i32
  }
  func.func @transform_3(%arg0: i32) -> (i32, i32) {
    %c0_i32 = arith.constant 0 : i32
    %c0_i32_0 = arith.constant 0 : i32
    %c0_i32_1 = arith.constant 0 : i32
    return %c0_i32, %c0_i32_0 : i32, i32
  }
  func.func @transform_4(%arg0: i32) -> (i32, i32) {
    %c0_i32 = arith.constant 0 : i32
    %c0_i32_0 = arith.constant 0 : i32
    %c0_i32_1 = arith.constant 0 : i32
    return %c0_i32, %c0_i32_0 : i32, i32
  }
  func.func @transform_5(%arg0: i32) -> (i32, i32) {
    %c0_i32 = arith.constant 0 : i32
    %c0_i32_0 = arith.constant 0 : i32
    return %arg0, %c0_i32 : i32, i32
  }
}

</mosaic_0001>

<bundles_post_ra>
// kernel: tpu_custom_call.1
= control target key start
LH: loop header
LB: loop body
LE: loop exit
PB: predicated region body
PF: predicated region fallthrough
CT: control target
= control target key end

     0   :  { %10 = vsyncpa [#allocation3], 0  ;;  %s354_s0 = inlined_call_operand.hbm [shape: f32[8,128], index: 0, kind: input, shape index: {}]   ;;  %s355_s1 = inlined_call_operand.hbm [shape: f32[128,128], index: 1, kind: input, shape index: {}]   ;;  %s356_s2 = inlined_call_operand.vmem [shape: f32[1,128], index: 2, kind: input, shape index: {}]   ;;  %s357_s3 = inlined_call_operand.hbm [shape: f32[128,128], index: 3, kind: input, shape index: {}]   ;;  %s358_s4 = inlined_call_operand.vmem [shape: f32[1,128], index: 4, kind: input, shape index: {}]   ;;  %s359_s5 = inlined_call_operand.hbm [shape: f32[8,128], index: 5, kind: output, shape index: {}]  }
   0x1   :  { %11 = vsyncpa [#allocation6], 0  ;;  %s28_s20 = sshll.u32 %s355_s1, 4  ;;  %s29_s20 = int_to_ptr.hbm [resolvable:$true] %s28_s20 }
   0x2   :  { %12 = vsyncpa [#allocation4], 0  ;;  %s300_s21 = smov [#allocation5]   ;;  %s18_s25 = sshll.u32 %s354_s0, 4  ;;  %s19_s25 = int_to_ptr.hbm [resolvable:$true] %s18_s25 }
   0x3   :  { %s30_s22 = sshll.u32 %s300_s21, 4  ;;  %s301_s26 = smov 128   ;;  %s31_s22 = int_to_ptr.vmem [resolvable:$true] %s30_s22 }
   0x4   :  { %s302_s27 = smov 8   ;;  %s303_s28 = smov [#allocation2]  }
   0x5   :  { %36 = dma.hbm_to_vmem [thread:$0]  %s29_s20, 2048, %s31_s22, [#allocation6], %s301_s26, %s301_s26, %s302_s27  }
   0x6   :  { %s20_s29 = sshll.u32 %s303_s28, 4  ;;  %s43_s7 = sshll.u32 %s357_s3, 4  ;;  %s21_s29 = int_to_ptr.vmem [resolvable:$true] %s20_s29  ;;  %s44_s7 = int_to_ptr.hbm [resolvable:$true] %s43_s7 }
   0x7   :  { %23 = dma.hbm_to_vmem [thread:$0]  %s19_s25, 128, %s21_s29, [#allocation3]  }
   0x8   :  { %s304_s1 = smov [#allocation7]  }
   0x9   :  { %s45_s8 = sshll.u32 %s304_s1, 4  ;;  %s46_s8 = int_to_ptr.vmem [resolvable:$true] %s45_s8 }
   0xa   :  { %51 = dma.hbm_to_vmem [thread:$0]  %s44_s7, 2048, %s46_s8, [#allocation6], %s301_s26, %s301_s26, %s302_s27  }
   0xb   :  { %294 = dma.done.wait [#allocation3], 128  }
   0xc   :  { %295 = vsyncadd [#allocation3], 4294967168 }
   0xd   :  { %296 = dma.done.wait [#allocation6], 4096  }
   0xe   :  { %297 = vsyncadd [#allocation6], 4294963200  ;;  %v82_v0 = vld [vmem:[#allocation5 + $0x78] sm:$0xff]  ;;  %v81_v1 = vld [vmem:[#allocation5 + $0x70] sm:$0xff]  ;;  %s305_s10 = smov [#allocation8]   ;;  %s174_s14 = sshll.u32 %s359_s5, 4  ;;  %s175_s14 = int_to_ptr.hbm [resolvable:$true] %s174_s14 }
   0xf   :  { %87 = vmatpush.msra.mxu0 %v82_v0  ;;  %v80_v2 = vld [vmem:[#allocation5 + $0x68] sm:$0xff]  ;;  %v79_v3 = vld [vmem:[#allocation5 + $0x60] sm:$0xff]  ;;  %v78_v4 = vld [vmem:[#allocation5 + $0x58] sm:$0xff]  ;;  %s172_s11 = sshll.u32 %s305_s10, 4  ;;  %s173_s11 = int_to_ptr.vmem [resolvable:$true] %s172_s11 }
  0x10   :  { %v77_v5 = vld [vmem:[#allocation5 + $0x50] sm:$0xff]  ;;  %v76_v6 = vld [vmem:[#allocation5 + $0x48] sm:$0xff]  ;;  %v75_v7 = vld [vmem:[#allocation5 + $0x40] sm:$0xff] }
  0x11   :  { %88 = vmatpush.msra.mxu0 %v81_v1  ;;  %v74_v8 = vld [vmem:[#allocation5 + $0x38] sm:$0xff]  ;;  %v73_v9 = vld [vmem:[#allocation5 + $0x30] sm:$0xff]  ;;  %v72_v10 = vld [vmem:[#allocation5 + $0x28] sm:$0xff] }
  0x12   :  { %v71_v11 = vld [vmem:[#allocation5 + $0x20] sm:$0xff]  ;;  %v70_v12 = vld [vmem:[#allocation5 + $0x18] sm:$0xff]  ;;  %v69_v13 = vld [vmem:[#allocation5 + $0x10] sm:$0xff] }
  0x13   :  { %89 = vmatpush.msra.mxu0 %v80_v2  ;;  %v68_v14 = vld [vmem:[#allocation5 + $0x8] sm:$0xff]  ;;  %v67_v15 = vld [vmem:[#allocation5] sm:$0xff]  ;;  %v66_v16 = vld [vmem:[#allocation2] sm:$0xff] }
  0x14   :  { %v141_v17 = vld [vmem:[#allocation7 + $0x78] sm:$0xff]  ;;  %v140_v18 = vld [vmem:[#allocation7 + $0x70] sm:$0xff]  ;;  %v139_v19 = vld [vmem:[#allocation7 + $0x68] sm:$0xff] }
  0x15   :  { %90 = vmatpush.msra.mxu0 %v79_v3  ;;  %146 = vmatpush.msra.mxu1 %v141_v17  ;;  %v138_v20 = vld [vmem:[#allocation7 + $0x60] sm:$0xff]  ;;  %v137_v21 = vld [vmem:[#allocation7 + $0x58] sm:$0xff]  ;;  %v136_v22 = vld [vmem:[#allocation7 + $0x50] sm:$0xff] }
  0x16   :  { %v135_v23 = vld [vmem:[#allocation7 + $0x48] sm:$0xff]  ;;  %v134_v24 = vld [vmem:[#allocation7 + $0x40] sm:$0xff]  ;;  %v133_v25 = vld [vmem:[#allocation7 + $0x38] sm:$0xff] }
  0x17   :  { %91 = vmatpush.msra.mxu0 %v78_v4  ;;  %147 = vmatpush.msra.mxu1 %v140_v18  ;;  %v132_v26 = vld [vmem:[#allocation7 + $0x30] sm:$0xff]  ;;  %v131_v27 = vld [vmem:[#allocation7 + $0x28] sm:$0xff]  ;;  %v130_v28 = vld [vmem:[#allocation7 + $0x20] sm:$0xff] }
  0x18   :  { %v129_v29 = vld [vmem:[#allocation7 + $0x18] sm:$0xff]  ;;  %v128_v30 = vld [vmem:[#allocation7 + $0x10] sm:$0xff]  ;;  %v127_v31 = vld [vmem:[#allocation7 + $0x8] sm:$0xff] }
  0x19   :  { %92 = vmatpush.msra.mxu0 %v77_v5  ;;  %148 = vmatpush.msra.mxu1 %v139_v19  ;;  %v126_v32 = vld [vmem:[#allocation7] sm:$0xff]  ;;  %v192_v33 = vld [vmem:[%s356_s2] ss:$0 sm:$0xff] }
  0x1a   :  { %v193_v49 = vld [vmem:[%s358_s4] ss:$0 sm:$0xff] }
  0x1b   :  { %93 = vmatpush.msra.mxu0 %v76_v6  ;;  %149 = vmatpush.msra.mxu1 %v138_v20 }
  0x1d   :  { %94 = vmatpush.msra.mxu0 %v75_v7  ;;  %150 = vmatpush.msra.mxu1 %v137_v21 }
  0x1f   :  { %95 = vmatpush.msra.mxu0 %v74_v8  ;;  %151 = vmatpush.msra.mxu1 %v136_v22 }
  0x21   :  { %96 = vmatpush.msra.mxu0 %v73_v9  ;;  %152 = vmatpush.msra.mxu1 %v135_v23 }
  0x23   :  { %97 = vmatpush.msra.mxu0 %v72_v10  ;;  %153 = vmatpush.msra.mxu1 %v134_v24 }
  0x25   :  { %98 = vmatpush.msra.mxu0 %v71_v11  ;;  %154 = vmatpush.msra.mxu1 %v133_v25 }
  0x27   :  { %99 = vmatpush.msra.mxu0 %v70_v12  ;;  %155 = vmatpush.msra.mxu1 %v132_v26 }
  0x29   :  { %100 = vmatpush.msra.mxu0 %v69_v13  ;;  %156 = vmatpush.msra.mxu1 %v131_v27 }
  0x2b   :  { %101 = vmatpush.msra.mxu0 %v68_v14  ;;  %157 = vmatpush.msra.mxu1 %v130_v28 }
  0x2d   :  { %102 = vmatpush.msra.mxu0 %v67_v15  ;;  %158 = vmatpush.msra.mxu1 %v129_v29 }
  0x2e   :  { %103 = vmatmul.f32.vlgmr.msra.gmra.mxu0 %v66_v16 }
  0x2f   :  { %159 = vmatpush.msra.mxu1 %v128_v30 }
  0x31   :  { %160 = vmatpush.msra.mxu1 %v127_v31 }
  0x33   :  { %161 = vmatpush.msra.mxu1 %v126_v32 }
  0xab   :  { %v104_v34 = vpop.f32.mrf.mxu0 }
  0xac   :  { %v105_v35 = vadd.f32 %v192_v33, %v104_v34 }
  0xae   :  { %v185_v36 = vmul.f32 -1.442695, %v105_v35 }
  0xb0   :  { %194 = vpow2.f32 %v185_v36 }
  0xb6   :  { %v195_v37 = vpop.eup %194 }
  0xb7   :  { %v110_v38 = vadd.f32 1.0, %v195_v37 }
  0xb9   :  { %196 = vrcp.f32 %v110_v38  ;;  %v122_v42 = vand.u32 2147483648, %v110_v38  ;;  %v120_v44 = vand.u32 2147483647, %v110_v38  ;;  %vm116_vm1 = vweird.f32 %v110_v38 }
  0xbb   :  { %v123_v46 = vor.u32 1.1754944e-38, %v122_v42  ;;  %vm121_vm3 = vcmp.eq.f32.partialorder %v120_v44, 8.507059e+37 }
  0xbf   :  { %v197_v39 = vpop.eup %196 }
  0xc0   :  { %v112_v40 = vmul.f32 %v197_v39, %v110_v38  ;;  %vm117_vm0 = vweird.f32 %v197_v39 }
  0xc1   :  { %vm118_vm2 = vmor %vm116_vm1, %vm117_vm0 }
  0xc2   :  { %v113_v41 = vsub.f32 1.0, %v112_v40 }
  0xc4   :  { %v114_v43 = vmul.f32 %v197_v39, %v113_v41 }
  0xc6   :  { %v115_v45 = vadd.f32 %v197_v39, %v114_v43 }
  0xc8   :  { %v119_v47 = vsel %vm118_vm2, %v197_v39, %v115_v45 }
  0xc9   :  { %v124_v48 = vsel %vm121_vm3, %v123_v46, %v119_v47 }
  0xca   :  { %162 = vmatmul.f32.vlgmr.msra.gmra.mxu1 %v124_v48 }
 0x147   :  { %v163_v50 = vpop.f32.mrf.mxu1 }
 0x148   :  { %v164_v51 = vadd.f32 %v193_v49, %v163_v50 }
 0x14a   :  { %166 = vst [vmem:[#allocation8] sm:$0xff] %v164_v51 }
 0x14b   :  { %177 = dma.vmem_to_hbm [thread:$0]  %s173_s11, 128, %s175_s14, [#allocation4]  }
 0x14c   :  { %298 = dma.done.wait [#allocation4], 128  }
 0x14d   :  { %299 = vsyncadd [#allocation4], 4294967168 }
 0x14e   :  { %182 = vsyncpa [#allocation3], 1 }
 0x14f   :  { %183 = vsyncpa [#allocation6], 1 }
 0x150   :  { %184 = vsyncpa [#allocation4], 1 }

</bundles_post_ra>
